<compile_context>
chip_gen: v7x
topology: tpu7x:2x2x1
jax: 0.10.0
libtpu: 0.0.40
codegen_flags: <defaults>
</compile_context>

<pallas_src>
import jax
import jax.numpy as jnp
from jax.experimental import pallas as pl
from jax.experimental.pallas import tpu as pltpu


def _round_up(x: int, m: int) -> int:
    return ((x + m - 1) // m) * m


def _bidecoder_kernel(q_ref, u_ref, it_ref, o_ref):
    """One (relation, u-tile, i-tile) grid step: out = (u @ q) @ i^T."""
    # q_ref : (1, D, D)    compute dtype (bf16 or f32)
    # u_ref : (TU, D)      compute dtype
    # it_ref: (D, TI)      compute dtype (pre-transposed i_features)
    # o_ref : (1, TU, TI)  f32
    tmp = jnp.dot(u_ref[...], q_ref[0], preferred_element_type=jnp.float32)
    out = jnp.dot(tmp.astype(u_ref.dtype), it_ref[...],
                  preferred_element_type=jnp.float32)
    o_ref[0] = out.astype(o_ref.dtype)


def bidecoder_forward(u_features, i_features, basis_matrix, coefs,
                      *, tile_u: int = 512, tile_i: int = 512,
                      compute_dtype=jnp.bfloat16):
    """Pallas implementation of BiDecoder.forward (accum != 'stack', no dropout).

    u_features:   (U, D) f32
    i_features:   (I, D) f32
    basis_matrix: (B, D*D) f32
    coefs:        (R, B) f32
    returns:      (U * I, R) f32
    """
    U, D = u_features.shape
    I, D2 = i_features.shape
    assert D == D2
    R, B = coefs.shape
    assert basis_matrix.shape == (B, D * D)

    # Hoisted q construction: q_all[r] = sum_b coefs[r, b] * basis[b].
    # R*D*D f32 is tiny; keeping it out of the kernel removes B broadcast+FMA
    # VPU passes per grid step and the SMEM scalar-prefetch plumbing.
    q_all = jnp.einsum("rb,bd->rd", coefs, basis_matrix).reshape(R, D, D)

    # Tile sizes: U tile sublane-aligned (x8), I tile lane-dense (x128).
    TU = _round_up(min(tile_u, _round_up(U, 8)), 8)
    TI = _round_up(min(tile_i, _round_up(I, 128)), 128)
    U_pad = _round_up(U, TU)
    I_pad = _round_up(I, TI)

    u_p = u_features
    if U_pad != U:
        u_p = jnp.pad(u_p, ((0, U_pad - U), (0, 0)))
    i_p = i_features
    if I_pad != I:
        i_p = jnp.pad(i_p, ((0, I_pad - I), (0, 0)))

    # One-time HBM-side transpose of the (grid-invariant) item features so the
    # in-kernel second matmul contracts the last dim of the LHS against the
    # first dim of the RHS (no repeated XLU transpose inside the kernel).
    u_c = u_p.astype(compute_dtype)
    it_c = i_p.T.astype(compute_dtype)
    q_c = q_all.astype(compute_dtype)

    # Explicit VMEM budget from the per-step footprint (double-buffered inputs
    # and output, plus headroom), clamped to v7x's 64 MiB physical VMEM.
    esize = jnp.dtype(compute_dtype).itemsize
    per_step_bytes = (D * D * esize + TU * D * esize + D * TI * esize
                      + TU * TI * 4)
    vmem_limit = int(min(max(4 * per_step_bytes + (4 << 20), 16 << 20),
                         64 << 20))

    grid = (R, U_pad // TU, I_pad // TI)

    out3 = pl.pallas_call(
        _bidecoder_kernel,
        out_shape=jax.ShapeDtypeStruct((R, U_pad, I_pad), jnp.float32),
        grid_spec=pl.GridSpec(
            grid=grid,
            in_specs=[
                pl.BlockSpec((1, D, D), lambda r, ui, ii: (r, 0, 0)),
                pl.BlockSpec((TU, D), lambda r, ui, ii: (ui, 0)),
                pl.BlockSpec((D, TI), lambda r, ui, ii: (0, ii)),
            ],
            out_specs=pl.BlockSpec((1, TU, TI), lambda r, ui, ii: (r, ui, ii)),
        ),
        compiler_params=pltpu.CompilerParams(
            dimension_semantics=("parallel", "parallel", "parallel"),
            vmem_limit_bytes=vmem_limit,
        ),
    )(q_c, u_c, it_c)

    # Drop padding, then (R, U, I) -> (U, I, R) -> (U*I, R) to match torch's
    # cat(dim=2) + reshape.  (For large U*I, consume (R, U, I) directly.)
    out3 = out3[:, :U, :I]
    return jnp.transpose(out3, (1, 2, 0)).reshape(U * I, R)


def bidecoder_reference(u_features, i_features, basis_matrix, coefs):
    """Pure-JAX reference mirroring the PyTorch forward (f32)."""
    U, D = u_features.shape
    I, _ = i_features.shape
    R, B = coefs.shape
    outs = []
    for r in range(R):
        q = jnp.sum(coefs[r][:, None] * basis_matrix, axis=0).reshape(D, D)
        outs.append(u_features @ q @ i_features.T)
    out = jnp.stack(outs, axis=2)
    return out.reshape(U * I, R)


if __name__ == "__main__":
    # Small shapes consistent with the module:
    # feature_dim (hidden_size[1]) = 32, num_basis = 4, num_relations = 3.
    # U, I chosen small but non-trivially shaped so the padding / lane-dense
    # tiling path is exercised (I pads to 256; U stays at 96).
    D, B, R = 32, 4, 3
    U, I = 96, 160

    key = jax.random.PRNGKey(0)
    k_basis, k_coef, k_u, k_i = jax.random.split(key, 4)

    # Deterministic "orthogonal" init for basis_matrix (rows orthonormal),
    # mimicking nn.init.orthogonal_ on a (B, D*D) tensor.
    a = jax.random.normal(k_basis, (D * D, B), dtype=jnp.float32)
    q_mat, _ = jnp.linalg.qr(a)                      # (D*D, B), orthonormal cols
    basis_matrix = q_mat.T.astype(jnp.float32)       # (B, D*D), orthonormal rows

    # Deterministic coefficient init (weight_init stand-in).
    coefs = (jax.random.normal(k_coef, (R, B), dtype=jnp.float32)
             * (1.0 / (B * R)))

    u_features = jax.random.normal(k_u, (U, D), dtype=jnp.float32)
    i_features = jax.random.normal(k_i, (I, D), dtype=jnp.float32)

    ref = bidecoder_reference(u_features, i_features, basis_matrix, coefs)

    # f32 compute path: must match the reference tightly.
    out_f32 = bidecoder_forward(u_features, i_features, basis_matrix, coefs,
                                compute_dtype=jnp.float32)
    out_f32 = jax.block_until_ready(out_f32)
    assert out_f32.shape == (U * I, R), out_f32.shape
    assert jnp.allclose(out_f32, ref, atol=1e-4, rtol=1e-4), (
        float(jnp.max(jnp.abs(out_f32 - ref))))

    # bf16 compute path (MXU-native, default): looser tolerance.
    out_bf16 = bidecoder_forward(u_features, i_features, basis_matrix, coefs,
                                 compute_dtype=jnp.bfloat16)
    out_bf16 = jax.block_until_ready(out_bf16)
    assert out_bf16.shape == (U * I, R), out_bf16.shape
    assert jnp.allclose(out_bf16, ref, atol=2e-2, rtol=2e-2), (
        float(jnp.max(jnp.abs(out_bf16 - ref))))

    print("KERNEL_OK")
</pallas_src>

<mosaic_0001>
module attributes {stable_mosaic.version = 11 : i64} {
  func.func @_bidecoder_kernel(%arg0: i32, %arg1: i32, %arg2: i32, %arg3: memref<1x32x32xf32, #tpu.memory_space<vmem>>, %arg4: memref<96x32xf32, #tpu.memory_space<vmem>>, %arg5: memref<32x256xf32, #tpu.memory_space<vmem>>, %arg6: memref<1x96x256xf32, #tpu.memory_space<vmem>>) attributes {dimension_semantics = [#tpu.dimension_semantics<parallel>, #tpu.dimension_semantics<parallel>, #tpu.dimension_semantics<parallel>], iteration_bounds = array<i64: 3, 1, 1>, scalar_prefetch = 0 : i64, scratch_operands = 0 : i64, tpu.core_type = #tpu.core_type<tc>, window_params = [{transform_indices = @transform_0, window_bounds = array<i64: 1, 32, 32>}, {transform_indices = @transform_1, window_bounds = array<i64: 96, 32>}, {transform_indices = @transform_2, window_bounds = array<i64: 32, 256>}, {transform_indices = @transform_3, window_bounds = array<i64: 1, 96, 256>}]} {
    %c0 = arith.constant 0 : index
    %c0_0 = arith.constant 0 : index
    %0 = vector.load %arg4[%c0, %c0_0] : memref<96x32xf32, #tpu.memory_space<vmem>>, vector<96x32xf32>
    %c0_1 = arith.constant 0 : index
    %c0_2 = arith.constant 0 : index
    %c0_3 = arith.constant 0 : index
    %1 = vector.load %arg3[%c0_1, %c0_2, %c0_3] : memref<1x32x32xf32, #tpu.memory_space<vmem>>, vector<1x32x32xf32>
    %2 = vector.shape_cast %1 : vector<1x32x32xf32> to vector<32x32xf32>
    %cst = arith.constant dense<0.000000e+00> : vector<96x32xf32>
    %3 = tpu.matmul %0, %2, %cst {dimension_numbers = #tpu.dot_dimension_numbers<[1], [0], [0], [1], [0, 0, 1, 1], [], []>} : vector<96x32xf32>, vector<32x32xf32>, vector<96x32xf32> -> vector<96x32xf32>
    %c0_4 = arith.constant 0 : index
    %c0_5 = arith.constant 0 : index
    %4 = vector.load %arg5[%c0_4, %c0_5] : memref<32x256xf32, #tpu.memory_space<vmem>>, vector<32x256xf32>
    %cst_6 = arith.constant dense<0.000000e+00> : vector<96x256xf32>
    %5 = tpu.matmul %3, %4, %cst_6 {dimension_numbers = #tpu.dot_dimension_numbers<[1], [0], [0], [1], [0, 0, 1, 1], [], []>} : vector<96x32xf32>, vector<32x256xf32>, vector<96x256xf32> -> vector<96x256xf32>
    %c0_7 = arith.constant 0 : index
    %c0_8 = arith.constant 0 : index
    %c0_9 = arith.constant 0 : index
    %6 = vector.load %arg6[%c0_7, %c0_8, %c0_9] : memref<1x96x256xf32, #tpu.memory_space<vmem>>, vector<1x96x256xf32>
    %7 = vector.shape_cast %6 : vector<1x96x256xf32> to vector<96x256xf32>
    %8 = vector.shape_cast %5 : vector<96x256xf32> to vector<1x96x256xf32>
    tpu.vector_store %arg6[%c0_7, %c0_8, %c0_9], %8 {strides = array<i32>} : memref<1x96x256xf32, #tpu.memory_space<vmem>>, vector<1x96x256xf32>,
    return
  }
  func.func @transform_0(%arg0: i32, %arg1: i32, %arg2: i32) -> (i32, i32, i32) {
    %c0_i32 = arith.constant 0 : i32
    %c0_i32_0 = arith.constant 0 : i32
    %c0_i32_1 = arith.constant 0 : i32
    return %arg0, %c0_i32, %c0_i32_0 : i32, i32, i32
  }
  func.func @transform_1(%arg0: i32, %arg1: i32, %arg2: i32) -> (i32, i32) {
    %c0_i32 = arith.constant 0 : i32
    %c0_i32_0 = arith.constant 0 : i32
    return %arg1, %c0_i32 : i32, i32
  }
  func.func @transform_2(%arg0: i32, %arg1: i32, %arg2: i32) -> (i32, i32) {
    %c0_i32 = arith.constant 0 : i32
    %c0_i32_0 = arith.constant 0 : i32
    return %c0_i32, %arg2 : i32, i32
  }
  func.func @transform_3(%arg0: i32, %arg1: i32, %arg2: i32) -> (i32, i32, i32) {
    %c0_i32 = arith.constant 0 : i32
    return %arg0, %arg1, %arg2 : i32, i32, i32
  }
}

</mosaic_0001>

<bundles_post_ra>
// kernel: tpu_custom_call.1
= control target key start
LH: loop header
LB: loop body
LE: loop exit
PB: predicated region body
PF: predicated region fallthrough
CT: control target
= control target key end

     0   :  { %8 = vsyncpa [#allocation3], 0  ;;  %s1305_s0 = inlined_call_operand.vmem [shape: f32[3,32,32], index: 0, kind: input, shape index: {}]   ;;  %s1306_s1 = inlined_call_operand.vmem [shape: f32[96,32], index: 1, kind: input, shape index: {}]   ;;  %s1307_s2 = inlined_call_operand.hbm [shape: f32[32,256], index: 2, kind: input, shape index: {}]   ;;  %s1308_s3 = inlined_call_operand.hbm [shape: f32[3,96,256], index: 3, kind: output, shape index: {}]  }
   0x1   :  { %9 = vsyncpa [#allocation4], 0 }
   0x2   :  { %11 = vsyncpa [#allocation4 + $0x1], 0  ;;  %s1061_s12 = smov 0   ;;  %s1063_s13 = smov 0  }
   0x3   :  { %s1065_s14 = smov 0   ;;  %s1067_s15 = smov 0  }
   0x4   :  { %s1069_s16 = smov 0   ;;  %s1071_s17 = smov 0  }
   0x5 LB: > { %s749_s18 = sadd.s32 4294967295, %s1032_s17   ;;  %s750_s19 = sadd.s32 4294967294, %s1032_s17   ;;  %s1032_s17 = sphi %s1071_s17, %s17_s17   ;;  %s1028_s16 = sphi %s1069_s16, %s1326_s16   ;;  %s1024_s15 = sphi %s1067_s15, %s1325_s15   ;;  %s1020_s14 = sphi %s1065_s14, %s1324_s14   ;;  %s1016_s13 = sphi %s1063_s13, %s1323_s13   ;;  %s1012_s12 = sphi %s1061_s12, %s1322_s12  }
   0x6   : > { %s36_s20 = sadd.s32 1, %s1028_s16  ;;  %s125_s21 = sadd.s32 1, %s1020_s14 }
   0x7   : > { %p38_p0 = scmp.ge.s32.totalorder %s36_s20, 3  ;;  %p135_p1 = scmp.ne.s32.totalorder %s1020_s14, %s1016_s13 }
   0x8   : > { %p136_p2 = scmp.eq.s32.totalorder %s749_s18, 2  ;;  %p141_p3 = scmp.ne.s32.totalorder %s1016_s13, %s1012_s12 }
   0x9   : > { %s1328_s20 = smov (%p38_p0, %s36_s20), 0  ;;  %p142_p5 = scmp.eq.s32.totalorder %s750_s19, 2 }
   0xa   : > { %p1101_p4 = por %p136_p2, %p135_p1  ;;  %s118_s23 = ssub.s32 %s1028_s16, %s1328_s20 }
   0xb   : > { %p751_p6 = scmp.ge.s32.totalorder %s1032_s17, 1  ;;  %p123_p7 = scmp.eq.s32.totalorder %s118_s23, 0 }
   0xc   : > { %s1313_s22 = scalar_select %p1101_p4, 1, 0 }
   0xd   : > { %p1108_p8 = por %p142_p5, %p141_p3  ;;  %p149_p9 = scmp.lt.s32.totalorder %s1032_s17, 4 }
   0xe   : > { %s1114_s25 = scalar_select %p123_p7, %s1020_s14, %s125_s21  }
   0xf   : > { %s1314_s24 = scalar_select %p1108_p8, 1, 0 }
  0x10   : > { %p1116_p10 = pnand %p751_p6, %p149_p9  ;;  %p1120_p11 = scmp.eq.s32.totalorder %s749_s18, 0 }
  0x11   : > { %s1034_s28 = smov [#allocation2]   ;;  %s922_s6 = scalar_lea.hbm %s1307_s2, 1024 }
  0x12   : > { %s1315_s26 = scalar_select %p1116_p10, 1, 0 }
  0x13   : > { %s1316_s27 = scalar_select %p1120_p11, 1, 0 }
  0x14   : > { %p857_p12 = pneg %p1116_p10  ;;  %s173_s29 = sshll.u32 %s1034_s28, 4  ;;  %s174_s29 = int_to_ptr.vmem [resolvable:$true] %s173_s29 }
  0x15   : > { %p923_p0 = scmp.ne.s32.totalorder %s1307_s2, %s922_s6  ;;  %p929_p5 = scmp.lt.u32.totalorder %s922_s6, %s1307_s2 }
  0x16   : > { %p1128_p13 = pnand %p1120_p11, %p857_p12 }
  0x18   : > { %p924_p1 = pneg %p1128_p13 }
  0x1a   : > { %p925_p2 = pnand %p924_p1, %p923_p0 }
  0x1c   : > { %p926_p3 = pneg %p925_p2 }
  0x1e   : > { %p931_p6 = pnand %p929_p5, %p926_p3 }
  0x20   : > { %934 = shalt.err (!%p931_p6)
}
  0x21   : > { %s935_s11 = scalar_lea.vmem %s174_s29, 1024  ;;  %p943_p8 = scmp.lt.s32.totalorder %s174_s29, %s174_s29 }
  0x22   : > { %p936_p7 = scmp.ne.s32.totalorder %s174_s29, %s935_s11  ;;  %p944_p4 = scmp.lt.s32.totalorder %s935_s11, %s935_s11 }
  0x24   : > { %p938_p9 = pnand %p936_p7, %p924_p1  ;;  %p945_p11 = por %p944_p4, %p943_p8 }
  0x26   : > { %p939_p12 = pneg %p938_p9 }
  0x28   : > { %p946_p10 = pnand %p945_p11, %p939_p12 }
  0x2a   : > { %949 = shalt.err (!%p946_p10)
}
  0x2b   : > { %s1035_s18 = smov 256   ;;  %s1036_s19 = smov 16  }
  0x2c   : > { %860 = dma.hbm_to_vmem [thread:$0]  (!%p1128_p13), %s1307_s2, 1024, %s174_s29, [#allocation3], %s1035_s18, %s1035_s18, %s1036_s19  }
  0x2d   : > { %p1318_p0 = scmp.ne.s32.totalorder %s1315_s26, 0 }
  0x2e   : > { %p1319_p2 = scmp.ne.s32.totalorder (!%p1318_p0), %s1316_s27, 0 }
  0x2f   : > { %197 = sbr.rel (%p1318_p0) target bundleno = 549 (0x225), region = 32 }
  0x36   : > { %1003 = dma.done.wait (%p1319_p2), [#allocation3], 1024  }
  0x37   : > { %1005 = vsyncadd (%p1319_p2), [#allocation3], 4294966272  ;;  %p226_p4 = scmp.lt.s32.totalorder %s1024_s15, 2  ;;  %vm256_vm0 = vcmask 261120   ;;  %v240_v5 = vld [vmem:[%s1306_s1] sm:$0xff]  ;;  %v419_v7 = vld [vmem:[#allocation2 + $0x8] sm:$0xff] }
  0x38   : > { %811 = vmatprep.mubr.msk.f32.mxu0 %vm256_vm0, %v240_v5  ;;  %v421_v8 = vld [vmem:[#allocation2 + $0x18] sm:$0xff]  ;;  %v418_v10 = vld [vmem:[#allocation2] sm:$0xff]  ;;  %v420_v11 = vld [vmem:[#allocation2 + $0x10] sm:$0xff]  ;;  %v1037_v30 = vmov 0.0   ;;  %s223_s11 = sand.u32 1, %s1016_s13   ;;  %s850_s21 = smul.u32 3072, %s1024_s15 }
  0x39   : > { %s227_s28 = scalar_select %p226_p4, %s1024_s15, 2  ;;  %v837_v9 = vpack.c.bf16 %v421_v8, %v419_v7  ;;  %v423_v12 = vld [vmem:[#allocation2 + $0x28] sm:$0xff]  ;;  %v839_v13 = vpack.c.bf16 %v420_v11, %v418_v10  ;;  %v425_v14 = vld [vmem:[#allocation2 + $0x38] sm:$0xff]  ;;  %v422_v17 = vld [vmem:[#allocation2 + $0x20] sm:$0xff]  ;;  %544 = vmatprep.mubr.f32.mxu1 %v1037_v30 }
  0x3a   : > { %v241_v15 = vld [vmem:[%s1306_s1 + $0x8] sm:$0xff]  ;;  %v841_v16 = vpack.c.bf16 %v425_v14, %v423_v12  ;;  %v424_v18 = vld [vmem:[#allocation2 + $0x30] sm:$0xff]  ;;  %v243_v21 = vld [vmem:[%s1306_s1 + $0x18] sm:$0xff]  ;;  %s849_s18 = smul.u32 192, %s223_s11  ;;  %s1251_s5 = scalar_lea.hbm %s1308_s3, %s850_s21 }
  0x3b   : > { %s786_s4 = sshll.u32 %s227_s28, 5  ;;  %845 = vmatprep.subr.bf16.mxu1 %v837_v9  ;;  %v242_v19 = vld [vmem:[%s1306_s1 + $0x10] sm:$0xff]  ;;  %v843_v20 = vpack.c.bf16 %v424_v18, %v422_v17  ;;  %v244_v22 = vld [vmem:[%s1306_s1 + $0x20] sm:$0xff]  ;;  %v245_v23 = vld [vmem:[%s1306_s1 + $0x28] sm:$0xff]  ;;  %s1259_s15 = scalar_lea.sflag [#allocation4], %s223_s11 }
  0x3c   : > { %s230_s6 = scalar_lea.vmem %s1305_s0, %s786_s4  ;;  %847 = vmatpush1.bf16.msra.mxu1 %v839_v13  ;;  %v246_v24 = vld [vmem:[%s1306_s1 + $0x30] sm:$0xff]  ;;  %v247_v25 = vld [vmem:[%s1306_s1 + $0x38] sm:$0xff]  ;;  %v248_v26 = vld [vmem:[%s1306_s1 + $0x40] sm:$0xff]  ;;  %s1222_s19 = scalar_lea.vmem [#allocation5], %s849_s18 }
  0x3d   : > { %v252_v0 = vld [vmem:[%s230_s6] sm:$0xff]  ;;  %v253_v1 = vld [vmem:[%s230_s6 + $0x8] sm:$0xff]  ;;  %v254_v2 = vld [vmem:[%s230_s6 + $0x10] sm:$0xff]  ;;  %846 = vmatprep.subr.bf16.mxu1 %v841_v16  ;;  %s642_s23 = sshll.u32 %s1222_s19, 4  ;;  %p1320_p10 = scmp.ne.s32.totalorder %s1313_s22, 0  ;;  %s1253_s23 = int_to_ptr.vmem [resolvable:$true] %s642_s23 }
  0x3e   : > { %v829_v3 = vpack.c.bf16 %v253_v1, %v252_v0  ;;  %v255_v4 = vld [vmem:[%s230_s6 + $0x18] sm:$0xff]  ;;  %v249_v27 = vld [vmem:[%s1306_s1 + $0x48] sm:$0xff]  ;;  %v250_v28 = vld [vmem:[%s1306_s1 + $0x50] sm:$0xff]  ;;  %s950_s30 = scalar_lea.vmem %s1253_s23, 3072  ;;  %s1038_s6 = smov [#allocation5]  }
  0x3f   : > { %v833_v6 = vpack.c.bf16 %v255_v4, %v254_v2  ;;  %v251_v29 = vld [vmem:[%s1306_s1 + $0x58] sm:$0xff]  ;;  %p951_p8 = scmp.ne.s32.totalorder %s1253_s23, %s950_s30  ;;  %s954_s26 = sshll.u32 %s1038_s6, 4  ;;  %s955_s26 = int_to_ptr.vmem [resolvable:$false] %s954_s26 }
  0x40   : > { %830 = vmatprep.subr.bf16.mxu0 %v829_v3  ;;  %848 = vmatpush1.bf16.msra.mxu1 %v843_v20  ;;  %s956_s29 = scalar_lea.vmem %s955_s26, 6144  ;;  %p957_p1 = scmp.lt.s32.totalorder %s1253_s23, %s955_s26 }
  0x41   : > { %832 = vmatpush3.bf16.msra.mxu0 %v829_v3  ;;  %p952_p11 = pnand %p951_p8, %p1320_p10  ;;  %p958_p3 = scmp.lt.s32.totalorder %s956_s29, %s950_s30 }
  0x42   : > { %834 = vmatprep.subr.bf16.mxu0 %v833_v6 }
  0x43   : > { %p953_p13 = pneg %p952_p11  ;;  %p959_p5 = por %p958_p3, %p957_p1 }
  0x45   : > { %836 = vmatpush3.bf16.msra.mxu0 %v833_v6  ;;  %p960_p6 = pnand %p959_p5, %p953_p13 }
  0x46   : > { %838 = vmatprep.subr.bf16.mxu0 %v837_v9 }
  0x48   : > { %812 = vmatmul.mubr.msk.f32.vlgmr.msra.gmra.mrb[0].mxu0 %vm256_vm0, %v241_v15 }
  0x49   : > { %814 = vmatprep.mubr.msk.f32.mxu0 %vm256_vm0, %v242_v19  ;;  %840 = vmatpush1.bf16.msra.mxu0 %v839_v13 }
  0x4a   : > { %842 = vmatprep.subr.bf16.mxu0 %v841_v16 }
  0x4c   : > { %815 = vmatmul.mubr.msk.f32.gmra.mrb[2].mxu0 %vm256_vm0, %v243_v21 }
  0x4d   : > { %817 = vmatprep.mubr.msk.f32.mxu0 %vm256_vm0, %v244_v22  ;;  %844 = vmatpush1.bf16.msra.mxu0 %v843_v20 }
  0x50   : > { %818 = vmatmul.mubr.msk.f32.gmra.mrb[4].mxu0 %vm256_vm0, %v245_v23 }
  0x51   : > { %820 = vmatprep.mubr.msk.f32.mxu0 %vm256_vm0, %v246_v24 }
  0x54   : > { %821 = vmatmul.mubr.msk.f32.gmra.mrb[6].mxu0 %vm256_vm0, %v247_v25 }
  0x55   : > { %823 = vmatprep.mubr.msk.f32.mxu0 %vm256_vm0, %v248_v26 }
  0x58   : > { %824 = vmatmul.mubr.msk.f32.gmra.mrb[8].mxu0 %vm256_vm0, %v249_v27 }
  0x59   : > { %826 = vmatprep.mubr.msk.f32.mxu0 %vm256_vm0, %v250_v28 }
  0x5c   : > { %827 = vmatmul.mubr.msk.f32.gmra.mrb[10].mxu0 %vm256_vm0, %v251_v29 }
  0x5d   : > { %526 = vmatprep.mubr.f32.mxu0 %v1037_v30 }
 0x11b   : > { %v813_v31 = vpop.f32.mrb[0].mxu0 }
 0x11c   : > { %v359_v32 = vpop.f32.mrb[1].mxu0 }
 0x11d   : > { %771 = vmatmul.mubr.msk.f32.vlgmr.msra.gmra.mrb[12].mxu0 %vm256_vm0, %v359_v32 }
 0x11e   : > { %532 = vmatprep.mubr.f32.mxu0 %v1037_v30 }
 0x11f   : > { %v816_v33 = vpop.f32.mrb[2].mxu0 }
 0x120   : > { %v369_v34 = vpop.f32.mrb[3].mxu0  ;;  %774 = vmatmul.mubr.msk.f32.vlgmr.msra.gmra.mrb[0].mxu1 %vm256_vm0, %v816_v33 }
 0x121   : > { %772 = vmatmul.mubr.msk.f32.gmra.mrb[14].mxu0 %vm256_vm0, %v813_v31  ;;  %550 = vmatprep.mubr.f32.mxu1 %v1037_v30 }
 0x122   : > { %538 = vmatprep.mubr.f32.mxu0 %v1037_v30 }
 0x123   : > { %v819_v35 = vpop.f32.mrb[4].mxu0 }
 0x124   : > { %v379_v36 = vpop.f32.mrb[5].mxu0 }
 0x125   : > { %773 = vmatmul.mubr.msk.f32.gmra.mrb[16].mxu0 %vm256_vm0, %v369_v34  ;;  %775 = vmatmul.mubr.msk.f32.gmra.mrb[2].mxu1 %vm256_vm0, %v379_v36 }
 0x126   : > { %556 = vmatprep.mubr.f32.mxu1 %v1037_v30 }
 0x127   : > { %v822_v37 = vpop.f32.mrb[6].mxu0 }
 0x128   : > { %v389_v38 = vpop.f32.mrb[7].mxu0 }
 0x129   : > { %776 = vmatmul.mubr.msk.f32.gmra.mrb[4].mxu1 %vm256_vm0, %v819_v35 }
 0x12a   : > { %562 = vmatprep.mubr.f32.mxu1 %v1037_v30 }
 0x12b   : > { %v825_v39 = vpop.f32.mrb[8].mxu0 }
 0x12c   : > { %v399_v40 = vpop.f32.mrb[9].mxu0 }
 0x12d   : > { %777 = vmatmul.mubr.msk.f32.gmra.mrb[6].mxu1 %vm256_vm0, %v389_v38 }
 0x12e   : > { %568 = vmatprep.mubr.f32.mxu1 %v1037_v30 }
 0x12f   : > { %v828_v41 = vpop.f32.mrb[10].mxu0 }
 0x130   : > { %v409_v42 = vpop.f32.mrb[11].mxu0 }
 0x131   : > { %778 = vmatmul.mubr.msk.f32.gmra.mrb[8].mxu1 %vm256_vm0, %v822_v37 }
 0x132   : > { %574 = vmatprep.mubr.f32.mxu1 %v1037_v30 }
 0x135   : > { %779 = vmatmul.mubr.msk.f32.gmra.mrb[10].mxu1 %vm256_vm0, %v399_v40 }
 0x136   : > { %580 = vmatprep.mubr.f32.mxu1 %v1037_v30 }
 0x139   : > { %780 = vmatmul.mubr.msk.f32.gmra.mrb[12].mxu1 %vm256_vm0, %v825_v39 }
 0x13a   : > { %586 = vmatprep.mubr.f32.mxu1 %v1037_v30 }
 0x13d   : > { %781 = vmatmul.mubr.msk.f32.gmra.mrb[14].mxu1 %vm256_vm0, %v409_v42 }
 0x13e   : > { %592 = vmatprep.mubr.f32.mxu1 %v1037_v30 }
 0x141   : > { %782 = vmatmul.mubr.msk.f32.gmra.mrb[16].mxu1 %vm256_vm0, %v828_v41 }
 0x1f0   : > { %v528_v43 = vpop.f32.mrb[12].mxu0 }
 0x1f1   : > { %599 = vst [vmem:[%s1222_s19] sm:$0xff] %v528_v43  ;;  %v530_v44 = vpop.f32.mrb[13].mxu0 }
 0x1f2   : > { %600 = vst [vmem:[%s1222_s19 + $0x8] sm:$0xff] %v530_v44 }
 0x1f3   : > { %v546_v45 = vpop.f32.mrb[0].mxu1 }
 0x1f4   : > { %605 = vst [vmem:[%s1222_s19 + $0x30] sm:$0xff] %v546_v45  ;;  %v534_v46 = vpop.f32.mrb[14].mxu0  ;;  %v548_v47 = vpop.f32.mrb[1].mxu1 }
 0x1f5   : > { %601 = vst [vmem:[%s1222_s19 + $0x10] sm:$0xff] %v534_v46  ;;  %606 = vst [vmem:[%s1222_s19 + $0x38] sm:$0xff] %v548_v47  ;;  %v536_v48 = vpop.f32.mrb[15].mxu0 }
 0x1f6   : > { %602 = vst [vmem:[%s1222_s19 + $0x18] sm:$0xff] %v536_v48 }
 0x1f8   : > { %v540_v49 = vpop.f32.mrb[16].mxu0  ;;  %v552_v50 = vpop.f32.mrb[2].mxu1 }
 0x1f9   : > { %603 = vst [vmem:[%s1222_s19 + $0x20] sm:$0xff] %v540_v49  ;;  %607 = vst [vmem:[%s1222_s19 + $0x40] sm:$0xff] %v552_v50  ;;  %v542_v51 = vpop.f32.mrb[17].mxu0  ;;  %v554_v52 = vpop.f32.mrb[3].mxu1 }
 0x1fa   : > { %604 = vst [vmem:[%s1222_s19 + $0x28] sm:$0xff] %v542_v51  ;;  %608 = vst [vmem:[%s1222_s19 + $0x48] sm:$0xff] %v554_v52 }
 0x1fc   : > { %v558_v53 = vpop.f32.mrb[4].mxu1 }
 0x1fd   : > { %609 = vst [vmem:[%s1222_s19 + $0x50] sm:$0xff] %v558_v53  ;;  %v560_v54 = vpop.f32.mrb[5].mxu1 }
 0x1fe   : > { %610 = vst [vmem:[%s1222_s19 + $0x58] sm:$0xff] %v560_v54 }
 0x200   : > { %v564_v55 = vpop.f32.mrb[6].mxu1 }
 0x201   : > { %611 = vst [vmem:[%s1222_s19 + $0x60] sm:$0xff] %v564_v55  ;;  %v566_v56 = vpop.f32.mrb[7].mxu1 }
 0x202   : > { %612 = vst [vmem:[%s1222_s19 + $0x68] sm:$0xff] %v566_v56 }
 0x204   : > { %v570_v57 = vpop.f32.mrb[8].mxu1 }
 0x205   : > { %613 = vst [vmem:[%s1222_s19 + $0x70] sm:$0xff] %v570_v57  ;;  %v572_v58 = vpop.f32.mrb[9].mxu1 }
 0x206   : > { %614 = vst [vmem:[%s1222_s19 + $0x78] sm:$0xff] %v572_v58 }
 0x208   : > { %v576_v59 = vpop.f32.mrb[10].mxu1 }
 0x209   : > { %615 = vst [vmem:[%s1222_s19 + $0x80] sm:$0xff] %v576_v59  ;;  %v578_v60 = vpop.f32.mrb[11].mxu1 }
 0x20a   : > { %616 = vst [vmem:[%s1222_s19 + $0x88] sm:$0xff] %v578_v60 }
 0x20c   : > { %v582_v61 = vpop.f32.mrb[12].mxu1 }
 0x20d   : > { %617 = vst [vmem:[%s1222_s19 + $0x90] sm:$0xff] %v582_v61  ;;  %v584_v62 = vpop.f32.mrb[13].mxu1 }
 0x20e   : > { %618 = vst [vmem:[%s1222_s19 + $0x98] sm:$0xff] %v584_v62 }
 0x210   : > { %v588_v63 = vpop.f32.mrb[14].mxu1 }
 0x211   : > { %619 = vst [vmem:[%s1222_s19 + $0xa0] sm:$0xff] %v588_v63  ;;  %v590_v0 = vpop.f32.mrb[15].mxu1 }
 0x212   : > { %620 = vst [vmem:[%s1222_s19 + $0xa8] sm:$0xff] %v590_v0 }
 0x214   : > { %v594_v1 = vpop.f32.mrb[16].mxu1 }
 0x215   : > { %621 = vst [vmem:[%s1222_s19 + $0xb0] sm:$0xff] %v594_v1  ;;  %v596_v2 = vpop.f32.mrb[17].mxu1 }
 0x216   : > { %622 = vst [vmem:[%s1222_s19 + $0xb8] sm:$0xff] %v596_v2 }
 0x217   : > { %963 = shalt.err (!%p960_p6)
}
 0x218   : > { %s964_s27 = scalar_lea.hbm %s1251_s5, 3072  ;;  %s968_s9 = scalar_lea.hbm %s1308_s3, 9216 }
 0x219   : > { %p965_p7 = scmp.ne.s32.totalorder %s1251_s5, %s964_s27  ;;  %p969_p0 = scmp.lt.u32.totalorder %s1251_s5, %s1308_s3 }
 0x21a   : > { %p970_p2 = scmp.lt.u32.totalorder %s968_s9, %s964_s27  ;;  %p972_p8 = scmp.lt.u32.totalorder %s964_s27, %s1251_s5 }
 0x21b   : > { %p966_p9 = pnand %p965_p7, %p1320_p10 }
 0x21c   : > { %p971_p4 = por %p970_p2, %p969_p0 }
 0x21d   : > { %p967_p12 = pneg %p966_p9 }
 0x21e   : > { %p973_p11 = por %p972_p8, %p971_p4 }
 0x220   : > { %p974_p13 = pnand %p973_p11, %p967_p12 }
 0x222   : > { %977 = shalt.err (!%p974_p13)
}
 0x223   : > { %s1039_s18 = smov 256   ;;  %s1040_s19 = smov 16  }
 0x224   : > { %855 = dma.vmem_to_hbm [thread:$0]  (%p1320_p10), %s1253_s23, 3072, %s1251_s5, %s1259_s15, %s1039_s18, %s1039_s18, %s1040_s19  }
 0x225 PF: > { %p867_p1 = scmp.ge.s32.totalorder %s1032_s17, 2  ;;  %s657_s21 = sand.u32 1, %s1012_s12  }
 0x226   : > { %p1321_p3 = scmp.ne.s32.totalorder %s1314_s24, 0  ;;  %s658_s28 = scalar_lea.sflag [#allocation4], %s657_s21 }
 0x228   : > { %p862_p5 = pnand %p867_p1, %p1321_p3 }
 0x22a   : > { %1007 = dma.done.wait (!%p862_p5), %s658_s28, 3072  }
 0x22b   : > { %1009 = vsyncadd (!%p862_p5), %s658_s28, 4294964224  ;;  %s17_s17 = sadd.s32 1, %s1032_s17   ;;  %s1322_s12 = smov %s1016_s13 }
 0x22c   : > { %p14_p6 = scmp.ge.s32.totalorder %s17_s17, 5   ;;  %s1323_s13 = smov %s1020_s14 }
 0x22d   : > { %s1324_s14 = smov %s1114_s25  ;;  %s1325_s15 = smov %s1028_s16 }
 0x22e   : > { %s1326_s16 = smov %s1328_s20  ;;  %16 = sbr.rel (!%p14_p6) target bundleno = 5 (0x5), region = 76 }
 0x235   :  { %663 = vsyncpa [#allocation3], 1 }
 0x236   :  { %665 = vsyncpa [#allocation3 + $0x1], 1 }
 0x237   :  { %666 = vsyncpa [#allocation4], 1 }
 0x238   :  { %668 = vsyncpa [#allocation4 + $0x1], 1 }

</bundles_post_ra>
